<compile_context>
chip_gen: v5e
topology: v5e:2x2
jax: 0.10.0
libtpu: 0.0.40
codegen_flags: <defaults>
</compile_context>

<pallas_src>
import jax
import jax.numpy as jnp
from jax import lax
from jax.experimental import pallas as pl
from jax.experimental.pallas import tpu as pltpu

LANES = 128                       # minimum lane-dense slab width
SUBLANES = 8
MAX_W = 4096                      # widest native last-dim kept as the lane dim
TILE_BYTES = 4 * 1024 * 1024      # input bytes per grid-step tile (double buffered)
CHUNK_BYTES = 256 * 1024          # ~f32 bytes processed per inner fori_loop step
MIN_PALLAS_ELEMS = 256 * 1024     # below this (1 MiB f32) plain XLA reduce wins
VMEM_LIMIT_BYTES = 32 * 1024 * 1024


def _num_tensorcores() -> int:
    """2 on chips with two TensorCores per chip (v7x / v4 / v5p), else 1."""
    try:
        kind = jax.devices()[0].device_kind.lower()
    except Exception:
        return 1
    return 2 if any(t in kind for t in ("v7", "7x", "v4", "v5p")) else 1


_NCORES = _num_tensorcores()


def _make_l1_kernel(w, tile_rows, chunk_rows, steps, total_blocks, valid_last):
    """Streaming L1 reduction over row-tiles of one [rows, w] weight slab."""
    last_blk = total_blocks - 1
    n_chunks = tile_rows // chunk_rows

    def accumulate(x_ref, acc_ref, masked):
        def body(k, carry):
            off = pl.multiple_of(k * chunk_rows, chunk_rows)
            # Upcast in-register; weights stream from HBM in their native dtype.
            x = jnp.abs(x_ref[pl.ds(off, chunk_rows), :].astype(jnp.float32))
            if masked:                                     # static trace-time switch
                rid = lax.broadcasted_iota(jnp.int32, (chunk_rows, 1), 0) + off
                x = jnp.where(rid < valid_last, x, 0.0)    # zero the ragged tail
            # Fold rows onto the sublane dim (layout-free) and add vregs (VPU).
            acc_ref[...] += x.reshape(chunk_rows // SUBLANES, SUBLANES, w).sum(axis=0)
            return carry
        lax.fori_loop(0, n_chunks, body, 0)

    def kernel(x_ref, out_ref, acc_ref):
        c = pl.program_id(0)          # core axis ("parallel", 2 only on 2-TC chips)
        i = pl.program_id(1)          # reduction over row tiles ("arbitrary")
        bidx = c * steps + i          # global row-tile index

        @pl.when(i == 0)
        def _():
            acc_ref[...] = jnp.zeros_like(acc_ref)

        @pl.when(bidx < last_blk)     # full tiles: no masking work
        def _():
            accumulate(x_ref, acc_ref, masked=False)

        @pl.when(bidx == last_blk)    # the (possibly ragged / partial) final tile
        def _():
            accumulate(x_ref, acc_ref, masked=(valid_last < tile_rows))
        # bidx > last_blk (duplicate tile on the 2-core split when the tile count
        # is odd): index_map clamps the DMA in-bounds and we simply skip it here.

        @pl.when(i == steps - 1)
        def _():
            # Single full cross-lane/cross-sublane reduce, once per core.
            out_ref[0, 0] = jnp.sum(acc_ref[...])

    return kernel


def _choose_width(v) -> int:
    """Lane width for a layout-friendly [rows, W] view of v's own bytes."""
    if v.ndim >= 2:
        w = v.shape[-1]
        if w % LANES == 0 and LANES <= w <= MAX_W:
            return w                  # keep the native minor dim: no relayout
    if v.size % LANES == 0:
        return LANES
    return 0                          # no lane-aligned view -> XLA fallback


def _l1_sum_array(v: jax.Array) -> jax.Array:
    """sum(|v|) in f32, streaming v once from HBM (no pad, no extra copies)."""
    n = v.size
    if n == 0:
        return jnp.float32(0.0)
    w = _choose_width(v)
    if n < MIN_PALLAS_ELEMS or w == 0:
        # Small / lane-misaligned tensors: pallas launch + pipeline fill/drain
        # dominates; XLA's fused reduce is ~HBM roofline for this anyway.
        return jnp.sum(jnp.abs(v.astype(jnp.float32)))

    rows = n // w
    slab = v.reshape(rows, w)         # contiguous fold (identity for 2-D weights)
    itemsize = v.dtype.itemsize

    # Inner-loop chunk: ~256 KiB of f32 work; rows a multiple of 32 so dynamic
    # sublane offsets stay aligned for every input dtype (f32/bf16/i8/fp8).
    chunk_rows = max(32, (CHUNK_BYTES // (w * 4)) // 32 * 32)
    # Grid-step tile: ~4 MiB of input, a multiple of chunk_rows, never > rows.
    tile_rows = max(chunk_rows,
                    (min(TILE_BYTES // (w * itemsize), rows) // chunk_rows) * chunk_rows)
    total_blocks = pl.cdiv(rows, tile_rows)
    valid_last = rows - (total_blocks - 1) * tile_rows    # valid rows in final tile

    ncores = min(_NCORES, total_blocks)
    steps = pl.cdiv(total_blocks, ncores)
    last_blk = total_blocks - 1

    kernel = _make_l1_kernel(w, tile_rows, chunk_rows, steps, total_blocks, valid_last)
    out = pl.pallas_call(
        kernel,
        out_shape=jax.ShapeDtypeStruct((ncores, 1), jnp.float32),
        grid_spec=pltpu.PrefetchScalarGridSpec(
            num_scalar_prefetch=0,
            grid=(ncores, steps),
            in_specs=[pl.BlockSpec(
                (tile_rows, w),
                lambda c, i: (jnp.minimum(c * steps + i, last_blk), 0))],
            out_specs=pl.BlockSpec((1, 1), lambda c, i: (c, 0),
                                   memory_space=pltpu.SMEM),
            scratch_shapes=[pltpu.VMEM((SUBLANES, w), jnp.float32)],
        ),
        compiler_params=pltpu.CompilerParams(
            dimension_semantics=("parallel", "arbitrary"),
            vmem_limit_bytes=VMEM_LIMIT_BYTES,
        ),
        cost_estimate=pl.CostEstimate(
            flops=2 * n,                                  # abs + add per element
            transcendentals=0,
            bytes_accessed=n * itemsize + ncores * 4),
    )(slab)
    return jnp.sum(out)


def fractal_regularization(params: dict, lambda_param: float = 0.01) -> jax.Array:
    """Equivalent of FractalRegularization.forward(model).

    params: dict name -> array. Only entries whose name contains 'weight'
    contribute, matching the PyTorch `named_parameters()` filter.
    """
    totals = [_l1_sum_array(v) for name, v in params.items() if "weight" in name]
    if not totals:
        return jnp.float32(0.0)
    return jnp.float32(lambda_param) * jnp.sum(jnp.stack(totals))


if __name__ == "__main__":
    key = jax.random.PRNGKey(0)
    k = jax.random.split(key, 6)
    params = {
        # Tiny tensors of a small conv/fc model (take the XLA fast path).
        "conv1.weight": jax.random.normal(k[0], (4, 4, 3, 3), dtype=jnp.float32),
        "conv1.bias":   jax.random.normal(k[1], (4,), dtype=jnp.float32),
        "fc.weight":    jax.random.normal(k[2], (32, 16), dtype=jnp.float32),
        "fc.bias":      jax.random.normal(k[3], (32,), dtype=jnp.float32),
        # Larger weights so the Pallas path is actually exercised:
        #   embed.weight -> single-tile kernel call (native 512-wide lanes).
        #   proj.weight  -> multi-tile reduction with a ragged, masked final tile.
        "embed.weight": jax.random.normal(k[4], (512, 512), dtype=jnp.float32),
        "proj.weight":  jax.random.normal(k[5], (8448, 128), dtype=jnp.float32),
    }

    lambda_param = 0.01
    reg_loss = jax.block_until_ready(fractal_regularization(params, lambda_param))

    # Pure-JAX reference (same semantics as the PyTorch module).
    ref = lambda_param * sum(
        jnp.sum(jnp.abs(v.astype(jnp.float32)))
        for name, v in params.items() if "weight" in name
    )
    assert jnp.allclose(reg_loss, ref, rtol=1e-4, atol=1e-4), (reg_loss, ref)

    print("KERNEL_OK")
</pallas_src>

<mosaic_0001>
module attributes {stable_mosaic.version = 11 : i64} {
  func.func @kernel(%arg0: i32, %arg1: i32, %arg2: memref<512x512xf32, #tpu.memory_space<vmem>>, %arg3: memref<1x1xf32, #tpu.memory_space<smem>>, %arg4: memref<8x512xf32, #tpu.memory_space<vmem>>) attributes {dimension_semantics = [#tpu.dimension_semantics<parallel>, #tpu.dimension_semantics<arbitrary>], iteration_bounds = array<i64: 1, 1>, scalar_prefetch = 0 : i64, scratch_operands = 1 : i64, tpu.core_type = #tpu.core_type<tc>, window_params = [{transform_indices = @transform_0, window_bounds = array<i64: 512, 512>}, {transform_indices = @transform_1, window_bounds = array<i64: 1, 1>}]} {
    %c1_i32 = arith.constant 1 : i32
    %0 = arith.muli %arg0, %c1_i32 : i32
    %1 = arith.addi %0, %arg1 : i32
    %c0_i32 = arith.constant 0 : i32
    %2 = arith.cmpi eq, %arg1, %c0_i32 : i32
    %3 = arith.extui %2 : i1 to i32
    %c0_i32_0 = arith.constant 0 : i32
    %4 = arith.cmpi ne, %3, %c0_i32_0 : i32
    scf.if %4 {
      %cst = arith.constant 0.000000e+00 : f32
      %14 = vector.broadcast %cst : f32 to vector<8x512xf32>
      %c0 = arith.constant 0 : index
      %c0_7 = arith.constant 0 : index
      %15 = vector.load %arg4[%c0, %c0_7] : memref<8x512xf32, #tpu.memory_space<vmem>>, vector<8x512xf32>
      tpu.vector_store %arg4[%c0, %c0_7], %14 {strides = array<i32>} : memref<8x512xf32, #tpu.memory_space<vmem>>, vector<8x512xf32>,
    } else {
    }
    %c0_i32_1 = arith.constant 0 : i32
    %5 = arith.cmpi slt, %1, %c0_i32_1 : i32
    %6 = arith.extui %5 : i1 to i32
    %c0_i32_2 = arith.constant 0 : i32
    %7 = arith.cmpi ne, %6, %c0_i32_2 : i32
    scf.if %7 {
      %c0_i32_7 = arith.constant 0 : i32
      %c4_i32 = arith.constant 4 : i32
      %14 = arith.addi %c0_i32_7, %c4_i32 : i32
      %c1_i32_8 = arith.constant 1 : i32
      scf.for %arg5 = %c0_i32_7 to %14 step %c1_i32_8  : i32 {
        %c128_i32 = arith.constant 128 : i32
        %15 = arith.muli %arg5, %c128_i32 : i32
        %16 = tpu.assume_multiple %15, 128 : i32
        %17 = arith.index_cast %16 : i32 to index
        %c0 = arith.constant 0 : index
        %18 = vector.load %arg2[%17, %c0] : memref<512x512xf32, #tpu.memory_space<vmem>>, vector<128x512xf32>
        %19 = math.absf %18 : vector<128x512xf32>
        %c0_10 = arith.constant 0 : index
        %c0_11 = arith.constant 0 : index
        %20 = vector.load %arg4[%c0_10, %c0_11] : memref<8x512xf32, #tpu.memory_space<vmem>>, vector<8x512xf32>
        %21 = vector.shape_cast %19 : vector<128x512xf32> to vector<16x8x512xf32>
        %cst = arith.constant dense<0.000000e+00> : vector<8x512xf32>
        %22 = vector.multi_reduction <add>, %21, %cst [0] : vector<16x8x512xf32> to vector<8x512xf32>
        %23 = arith.addf %20, %22 : vector<8x512xf32>
        %c0_12 = arith.constant 0 : index
        %c0_13 = arith.constant 0 : index
        %24 = vector.load %arg4[%c0_12, %c0_13] : memref<8x512xf32, #tpu.memory_space<vmem>>, vector<8x512xf32>
        tpu.vector_store %arg4[%c0_12, %c0_13], %23 {strides = array<i32>} : memref<8x512xf32, #tpu.memory_space<vmem>>, vector<8x512xf32>,
      }
      %c4_i32_9 = arith.constant 4 : i32
    } else {
    }
    %c0_i32_3 = arith.constant 0 : i32
    %8 = arith.cmpi eq, %1, %c0_i32_3 : i32
    %9 = arith.extui %8 : i1 to i32
    %c0_i32_4 = arith.constant 0 : i32
    %10 = arith.cmpi ne, %9, %c0_i32_4 : i32
    scf.if %10 {
      %c0_i32_7 = arith.constant 0 : i32
      %c4_i32 = arith.constant 4 : i32
      %14 = arith.addi %c0_i32_7, %c4_i32 : i32
      %c1_i32_8 = arith.constant 1 : i32
      scf.for %arg5 = %c0_i32_7 to %14 step %c1_i32_8  : i32 {
        %c128_i32 = arith.constant 128 : i32
        %15 = arith.muli %arg5, %c128_i32 : i32
        %16 = tpu.assume_multiple %15, 128 : i32
        %17 = arith.index_cast %16 : i32 to index
        %c0 = arith.constant 0 : index
        %18 = vector.load %arg2[%17, %c0] : memref<512x512xf32, #tpu.memory_space<vmem>>, vector<128x512xf32>
        %19 = math.absf %18 : vector<128x512xf32>
        %c0_10 = arith.constant 0 : index
        %c0_11 = arith.constant 0 : index
        %20 = vector.load %arg4[%c0_10, %c0_11] : memref<8x512xf32, #tpu.memory_space<vmem>>, vector<8x512xf32>
        %21 = vector.shape_cast %19 : vector<128x512xf32> to vector<16x8x512xf32>
        %cst = arith.constant dense<0.000000e+00> : vector<8x512xf32>
        %22 = vector.multi_reduction <add>, %21, %cst [0] : vector<16x8x512xf32> to vector<8x512xf32>
        %23 = arith.addf %20, %22 : vector<8x512xf32>
        %c0_12 = arith.constant 0 : index
        %c0_13 = arith.constant 0 : index
        %24 = vector.load %arg4[%c0_12, %c0_13] : memref<8x512xf32, #tpu.memory_space<vmem>>, vector<8x512xf32>
        tpu.vector_store %arg4[%c0_12, %c0_13], %23 {strides = array<i32>} : memref<8x512xf32, #tpu.memory_space<vmem>>, vector<8x512xf32>,
      }
      %c4_i32_9 = arith.constant 4 : i32
    } else {
    }
    %c0_i32_5 = arith.constant 0 : i32
    %11 = arith.cmpi eq, %arg1, %c0_i32_5 : i32
    %12 = arith.extui %11 : i1 to i32
    %c0_i32_6 = arith.constant 0 : i32
    %13 = arith.cmpi ne, %12, %c0_i32_6 : i32
    scf.if %13 {
      %c0 = arith.constant 0 : index
      %c0_7 = arith.constant 0 : index
      %14 = vector.load %arg4[%c0, %c0_7] : memref<8x512xf32, #tpu.memory_space<vmem>>, vector<8x512xf32>
      %15 = vector.shape_cast %14 : vector<8x512xf32> to vector<1x8x512xf32>
      %cst = arith.constant dense<0.000000e+00> : vector<1xf32>
      %16 = vector.multi_reduction <add>, %15, %cst [1, 2] : vector<1x8x512xf32> to vector<1xf32>
      %17 = vector.shape_cast %16 : vector<1xf32> to vector<1x1x1xf32>
      %18 = vector.extract %17[0, 0, 0] : f32 from vector<1x1x1xf32>
      %c0_8 = arith.constant 0 : index
      %c0_9 = arith.constant 0 : index
      %19 = memref.load %arg3[%c0_8, %c0_9] : memref<1x1xf32, #tpu.memory_space<smem>>
      memref.store %18, %arg3[%c0_8, %c0_9] : memref<1x1xf32, #tpu.memory_space<smem>>
    } else {
    }
    return
  }
  func.func @transform_0(%arg0: i32, %arg1: i32) -> (i32, i32) {
    %c1_i32 = arith.constant 1 : i32
    %0 = arith.muli %arg0, %c1_i32 : i32
    %1 = arith.addi %0, %arg1 : i32
    %c0_i32 = arith.constant 0 : i32
    %2 = arith.minsi %1, %c0_i32 : i32
    %c0_i32_0 = arith.constant 0 : i32
    %c0_i32_1 = arith.constant 0 : i32
    return %2, %c0_i32_0 : i32, i32
  }
  func.func @transform_1(%arg0: i32, %arg1: i32) -> (i32, i32) {
    %c0_i32 = arith.constant 0 : i32
    %c0_i32_0 = arith.constant 0 : i32
    return %arg0, %c0_i32 : i32, i32
  }
}

</mosaic_0001>

<bundles_post_ra>
// kernel: tpu_custom_call.1
= control target key start
LH: loop header
LB: loop body
LE: loop exit
PB: predicated region body
PF: predicated region fallthrough
CT: control target
= control target key end

     0   :  { %6 = vsyncpa [#allocation4], 0  ;;  %s697_s0 = inlined_call_operand.hbm [shape: f32[512,512], index: 0, kind: input, shape index: {}]   ;;  %s698_s1 = inlined_call_operand.hbm [shape: f32[1,1], index: 1, kind: output, shape index: {}]  }
   0x1   :  { %7 = vsyncpa [#allocation5], 0  ;;  %s19_s8 = sshll.u32 %s697_s0, 4  ;;  %s601_s9 = smov [#allocation3]   ;;  %s20_s8 = int_to_ptr.hbm [resolvable:$true] %s19_s8 }
   0x2   :  { %s21_s10 = sshll.u32 %s601_s9, 4  ;;  %s602_s11 = smov 512   ;;  %s22_s10 = int_to_ptr.vmem [resolvable:$true] %s21_s10 }
   0x3   :  { %s603_s12 = smov 32  }
   0x4   :  { %27 = dma.hbm_to_vmem [thread:$0]  %s20_s8, 32768, %s22_s10, [#allocation4], %s602_s11, %s602_s11, %s603_s12  }
   0x5   :  { %593 = dma.done.wait [#allocation4], 32768  }
   0x6   :  { %594 = vsyncadd [#allocation4], 4294934528  ;;  %v604_v0 = vmov 0.0   ;;  %s619_s13 = smov 0  }
   0x7   :  { %41 = vst [vmem:[#allocation2 + $0x10] sm:$0xff] %v604_v0 }
   0x8   :  { %42 = vst [vmem:[#allocation2] sm:$0xff] %v604_v0 }
   0x9   :  { %43 = vst [vmem:[#allocation2 + $0x18] sm:$0xff] %v604_v0 }
   0xa   :  { %44 = vst [vmem:[#allocation2 + $0x8] sm:$0xff] %v604_v0 }
   0xb LB: > { %s533_s0 = sshll.u32 %s599_s13, 7  ;;  %s270_s13 = sadd.s32 1, %s599_s13   ;;  %s599_s13 = sphi %s619_s13, %s270_s13  }
   0xc   : > { %s272_s14 = sshra.s32 %s533_s0, 3  ;;  %p267_p0 = scmp.ge.s32.totalorder %s270_s13, 4  }
   0xd   : > { %s537_s15 = sshll.u32 %s272_s14, 5  ;;  %s503_s19 = sshll.u32 (%p267_p0), %s698_s1, 4  ;;  %s504_s19 = int_to_ptr.hbm [resolvable:$true] %s503_s19 }
   0xe   : > { %s625_s16 = scalar_lea.vmem [#allocation3], %s537_s15  ;;  %s605_s21 = smov (%p267_p0), [#allocation6]  }
   0xf   : > { %v277_v1 = vld [vmem:[%s625_s16] sm:$0xff]  ;;  %v278_v15 = vld [vmem:[%s625_s16 + $0x8] sm:$0xff]  ;;  %v279_v49 = vld [vmem:[%s625_s16 + $0x10] sm:$0xff] }
  0x10   : > { %v281_v2 = vld [vmem:[%s625_s16 + $0x20] sm:$0xff]  ;;  %v341_v5 = vand.u32 2147483647, %v277_v1  ;;  %v282_v19 = vld [vmem:[%s625_s16 + $0x28] sm:$0xff]  ;;  %v342_v24 = vand.u32 2147483647, %v278_v15 }
  0x11   : > { %v285_v3 = vld [vmem:[%s625_s16 + $0x40] sm:$0xff]  ;;  %v345_v6 = vand.u32 2147483647, %v281_v2  ;;  %v286_v20 = vld [vmem:[%s625_s16 + $0x48] sm:$0xff]  ;;  %v346_v26 = vand.u32 2147483647, %v282_v19 }
  0x12   : > { %v289_v4 = vld [vmem:[%s625_s16 + $0x60] sm:$0xff]  ;;  %v349_v8 = vand.u32 2147483647, %v285_v3  ;;  %v290_v23 = vld [vmem:[%s625_s16 + $0x68] sm:$0xff]  ;;  %v350_v30 = vand.u32 2147483647, %v286_v20 }
  0x13   : > { %v293_v7 = vld [vmem:[%s625_s16 + $0x80] sm:$0xff]  ;;  %v353_v9 = vand.u32 2147483647, %v289_v4  ;;  %v409_v10 = vadd.f32 %v345_v6, %v341_v5  ;;  %v294_v29 = vld [vmem:[%s625_s16 + $0x88] sm:$0xff]  ;;  %v354_v32 = vand.u32 2147483647, %v290_v23  ;;  %v424_v33 = vadd.f32 %v346_v26, %v342_v24 }
  0x14   : > { %v297_v11 = vld [vmem:[%s625_s16 + $0xa0] sm:$0xff]  ;;  %v357_v12 = vand.u32 2147483647, %v293_v7  ;;  %v298_v36 = vld [vmem:[%s625_s16 + $0xa8] sm:$0xff]  ;;  %v358_v38 = vand.u32 2147483647, %v294_v29 }
  0x15   : > { %v410_v13 = vadd.f32 %v409_v10, %v349_v8  ;;  %v301_v14 = vld [vmem:[%s625_s16 + $0xc0] sm:$0xff]  ;;  %v361_v16 = vand.u32 2147483647, %v297_v11  ;;  %v425_v39 = vadd.f32 %v424_v33, %v350_v30  ;;  %v302_v42 = vld [vmem:[%s625_s16 + $0xc8] sm:$0xff]  ;;  %v362_v44 = vand.u32 2147483647, %v298_v36 }
  0x16   : > { %v305_v18 = vld [vmem:[%s625_s16 + $0xe0] sm:$0xff]  ;;  %v365_v21 = vand.u32 2147483647, %v301_v14  ;;  %v306_v48 = vld [vmem:[%s625_s16 + $0xe8] sm:$0xff]  ;;  %v283_v50 = vld [vmem:[%s625_s16 + $0x30] sm:$0xff] }
  0x17   : > { %v411_v17 = vadd.f32 %v410_v13, %v353_v9  ;;  %v309_v25 = vld [vmem:[%s625_s16 + $0x100] sm:$0xff]  ;;  %v369_v27 = vand.u32 2147483647, %v305_v18  ;;  %v426_v45 = vadd.f32 %v425_v39, %v354_v32  ;;  %v366_v52 = vand.u32 2147483647, %v302_v42  ;;  %v310_v57 = vld [vmem:[%s625_s16 + $0x108] sm:$0xff] }
  0x18   : > { %v313_v31 = vld [vmem:[%s625_s16 + $0x120] sm:$0xff]  ;;  %v373_v34 = vand.u32 2147483647, %v309_v25  ;;  %v343_v54 = vand.u32 2147483647, %v279_v49  ;;  %v287_v58 = vld [vmem:[%s625_s16 + $0x50] sm:$0xff] }
  0x19   : > { %v412_v22 = vadd.f32 %v411_v17, %v357_v12  ;;  %v317_v37 = vld [vmem:[%s625_s16 + $0x140] sm:$0xff]  ;;  %v377_v40 = vand.u32 2147483647, %v313_v31  ;;  %v427_v53 = vadd.f32 %v426_v45, %v358_v38  ;;  %v347_v59 = vand.u32 2147483647, %v283_v50  ;;  %v314_v1 = vld [vmem:[%s625_s16 + $0x128] sm:$0xff] }
  0x1a   : > { %v321_v43 = vld [vmem:[%s625_s16 + $0x160] sm:$0xff]  ;;  %v381_v46 = vand.u32 2147483647, %v317_v37  ;;  %v370_v61 = vand.u32 2147483647, %v306_v48  ;;  %v291_v2 = vld [vmem:[%s625_s16 + $0x70] sm:$0xff] }
  0x1b   : > { %v413_v28 = vadd.f32 %v412_v22, %v361_v16  ;;  %v325_v51 = vld [vmem:[%s625_s16 + $0x180] sm:$0xff]  ;;  %v385_v55 = vand.u32 2147483647, %v321_v43  ;;  %v428_v62 = vadd.f32 %v427_v53, %v362_v44  ;;  %v374_v5 = vand.u32 2147483647, %v310_v57  ;;  %v318_v11 = vld [vmem:[%s625_s16 + $0x148] sm:$0xff] }
  0x1c   : > { %v329_v60 = vld [vmem:[%s625_s16 + $0x1a0] sm:$0xff]  ;;  %v389_v63 = vand.u32 2147483647, %v325_v51  ;;  %v351_v7 = vand.u32 2147483647, %v287_v58  ;;  %v439_v8 = vadd.f32 %v347_v59, %v343_v54  ;;  %v295_v12 = vld [vmem:[%s625_s16 + $0x90] sm:$0xff] }
  0x1d   : > { %v414_v35 = vadd.f32 %v413_v28, %v365_v21  ;;  %v333_v3 = vld [vmem:[%s625_s16 + $0x1c0] sm:$0xff]  ;;  %v429_v6 = vadd.f32 %v428_v62, %v366_v52  ;;  %v393_v9 = vand.u32 2147483647, %v329_v60  ;;  %v322_v13 = vld [vmem:[%s625_s16 + $0x168] sm:$0xff]  ;;  %v378_v14 = vand.u32 2147483647, %v314_v1 }
  0x1e   : > { %v337_v4 = vld [vmem:[%s625_s16 + $0x1e0] sm:$0xff]  ;;  %v355_v16 = vand.u32 2147483647, %v291_v2  ;;  %v397_v17 = vand.u32 2147483647, %v333_v3  ;;  %v299_v20 = vld [vmem:[%s625_s16 + $0xb0] sm:$0xff]  ;;  %v440_v24 = vadd.f32 %v439_v8, %v351_v7 }
  0x1f   : > { %v415_v41 = vadd.f32 %v414_v35, %v369_v27  ;;  %v430_v15 = vadd.f32 %v429_v6, %v370_v61  ;;  %v401_v18 = vand.u32 2147483647, %v337_v4  ;;  %v382_v21 = vand.u32 2147483647, %v318_v11  ;;  %v280_v25 = vld [vmem:[%s625_s16 + $0x18] sm:$0xff]  ;;  %v326_v28 = vld [vmem:[%s625_s16 + $0x188] sm:$0xff] }
  0x20   : > { %v359_v23 = vand.u32 2147483647, %v295_v12  ;;  %v284_v26 = vld [vmem:[%s625_s16 + $0x38] sm:$0xff]  ;;  %v386_v29 = vand.u32 2147483647, %v322_v13  ;;  %v303_v30 = vld [vmem:[%s625_s16 + $0xd0] sm:$0xff] }
  0x21   : > { %v416_v47 = vadd.f32 %v415_v41, %v373_v34  ;;  %v431_v22 = vadd.f32 %v430_v15, %v374_v5  ;;  %v344_v31 = vand.u32 2147483647, %v280_v25  ;;  %v363_v33 = vand.u32 2147483647, %v299_v20  ;;  %v288_v35 = vld [vmem:[%s625_s16 + $0x58] sm:$0xff]  ;;  %v330_v38 = vld [vmem:[%s625_s16 + $0x1a8] sm:$0xff] }
  0x22   : > { %v441_v34 = vadd.f32 %v440_v24, %v355_v16  ;;  %v348_v36 = vand.u32 2147483647, %v284_v26  ;;  %v307_v39 = vld [vmem:[%s625_s16 + $0xf0] sm:$0xff]  ;;  %v390_v41 = vand.u32 2147483647, %v326_v28  ;;  %v292_v45 = vld [vmem:[%s625_s16 + $0x78] sm:$0xff] }
  0x23   : > { %v417_v56 = vadd.f32 %v416_v47, %v377_v40  ;;  %v432_v32 = vadd.f32 %v431_v22, %v378_v14  ;;  %v405_v40 = vld [vmem:[#allocation2 + $0x10] sm:$0xff]  ;;  %v367_v43 = vand.u32 2147483647, %v303_v30  ;;  %v334_v47 = vld [vmem:[%s625_s16 + $0x1c8] sm:$0xff]  ;;  %v352_v49 = vand.u32 2147483647, %v288_v35 }
  0x24   : > { %v442_v44 = vadd.f32 %v441_v34, %v359_v23  ;;  %v311_v48 = vld [vmem:[%s625_s16 + $0x110] sm:$0xff]  ;;  %v454_v50 = vadd.f32 %v348_v36, %v344_v31  ;;  %v394_v51 = vand.u32 2147483647, %v330_v38  ;;  %v371_v53 = vand.u32 2147483647, %v307_v39  ;;  %v338_v57 = vld [vmem:[%s625_s16 + $0x1e8] sm:$0xff] }
  0x25   : > { %v418_v0 = vadd.f32 %v417_v56, %v381_v46  ;;  %v433_v42 = vadd.f32 %v432_v32, %v382_v21  ;;  %v315_v58 = vld [vmem:[%s625_s16 + $0x130] sm:$0xff]  ;;  %v356_v59 = vand.u32 2147483647, %v292_v45  ;;  %v398_v60 = vand.u32 2147483647, %v334_v47  ;;  %v304_v8 = vld [vmem:[%s625_s16 + $0xd8] sm:$0xff] }
  0x26   : > { %v443_v54 = vadd.f32 %v442_v44, %v363_v33  ;;  %v375_v62 = vand.u32 2147483647, %v311_v48  ;;  %v319_v1 = vld [vmem:[%s625_s16 + $0x150] sm:$0xff]  ;;  %v455_v3 = vadd.f32 %v454_v50, %v352_v49  ;;  %v402_v4 = vand.u32 2147483647, %v338_v57  ;;  %v308_v15 = vld [vmem:[%s625_s16 + $0xf8] sm:$0xff] }
  0x27   : > { %v419_v10 = vadd.f32 %v418_v0, %v385_v55  ;;  %v434_v52 = vadd.f32 %v433_v42, %v386_v29  ;;  %v296_v55 = vld [vmem:[%s625_s16 + $0x98] sm:$0xff]  ;;  %v379_v6 = vand.u32 2147483647, %v315_v58  ;;  %v383_v13 = vand.u32 2147483647, %v319_v1  ;;  %v406_v16 = vld [vmem:[#allocation2] sm:$0xff] }
  0x28   : > { %v300_v0 = vld [vmem:[%s625_s16 + $0xb8] sm:$0xff]  ;;  %v360_v2 = vand.u32 2147483647, %v296_v55  ;;  %v456_v11 = vadd.f32 %v455_v3, %v356_v59  ;;  %v331_v24 = vld [vmem:[%s625_s16 + $0x1b0] sm:$0xff]  ;;  %v372_v25 = vand.u32 2147483647, %v308_v15 }
  0x29   : > { %v420_v19 = vadd.f32 %v419_v10, %v389_v63  ;;  %v435_v61 = vadd.f32 %v434_v52, %v390_v41  ;;  %v444_v63 = vadd.f32 %v443_v54, %v367_v43  ;;  %v364_v10 = vand.u32 2147483647, %v300_v0  ;;  %v312_v23 = vld [vmem:[%s625_s16 + $0x118] sm:$0xff]  ;;  %v335_v31 = vld [vmem:[%s625_s16 + $0x1d0] sm:$0xff] }
  0x2a   : > { %v316_v30 = vld [vmem:[%s625_s16 + $0x138] sm:$0xff]  ;;  %v376_v32 = vand.u32 2147483647, %v312_v23  ;;  %v395_v34 = vand.u32 2147483647, %v331_v24 }
  0x2b   : > { %v421_v27 = vadd.f32 %v420_v19, %v393_v9  ;;  %v436_v5 = vadd.f32 %v435_v61, %v394_v51  ;;  %v445_v7 = vadd.f32 %v444_v63, %v371_v53  ;;  %v323_v9 = vld [vmem:[%s625_s16 + $0x170] sm:$0xff]  ;;  %v457_v19 = vadd.f32 %v456_v11, %v360_v2  ;;  %v320_v36 = vld [vmem:[%s625_s16 + $0x158] sm:$0xff]  ;;  %v408_v2 = vld [vmem:[#allocation2 + $0x8] sm:$0xff] }
  0x2c   : > { %v387_v21 = vand.u32 2147483647, %v323_v9  ;;  %v380_v38 = vand.u32 2147483647, %v316_v30  ;;  %v324_v42 = vld [vmem:[%s625_s16 + $0x178] sm:$0xff] }
  0x2d   : > { %v422_v37 = vadd.f32 %v421_v27, %v397_v17  ;;  %v437_v12 = vadd.f32 %v436_v5, %v398_v60  ;;  %v446_v14 = vadd.f32 %v445_v7, %v375_v62  ;;  %v327_v17 = vld [vmem:[%s625_s16 + $0x190] sm:$0xff]  ;;  %v458_v26 = vadd.f32 %v457_v19, %v364_v10  ;;  %v328_v47 = vld [vmem:[%s625_s16 + $0x198] sm:$0xff] }
  0x2e   : > { %v391_v28 = vand.u32 2147483647, %v327_v17  ;;  %v384_v43 = vand.u32 2147483647, %v320_v36  ;;  %v388_v48 = vand.u32 2147483647, %v324_v42 }
  0x2f   : > { %v423_v46 = vadd.f32 %v422_v37, %v401_v18  ;;  %v368_v18 = vand.u32 2147483647, %v304_v8  ;;  %v438_v20 = vadd.f32 %v437_v12, %v402_v4  ;;  %v447_v22 = vadd.f32 %v446_v14, %v379_v6  ;;  %v339_v37 = vld [vmem:[%s625_s16 + $0x1f0] sm:$0xff]  ;;  %v332_v51 = vld [vmem:[%s625_s16 + $0x1b8] sm:$0xff] }
  0x30   : > { %v403_v45 = vand.u32 2147483647, %v339_v37  ;;  %v407_v52 = vld [vmem:[#allocation2 + $0x18] sm:$0xff]  ;;  %v392_v53 = vand.u32 2147483647, %v328_v47 }
  0x31   : > { %v469_v56 = vadd.f32 %v423_v46, %v405_v40  ;;  %v470_v27 = vadd.f32 %v438_v20, %v406_v16  ;;  %v448_v29 = vadd.f32 %v447_v22, %v383_v13  ;;  %v459_v33 = vadd.f32 %v458_v26, %v368_v18  ;;  %v340_v60 = vld [vmem:[%s625_s16 + $0x1f8] sm:$0xff] }
  0x32   : > { %v399_v40 = vand.u32 2147483647, %v335_v31  ;;  %v396_v57 = vand.u32 2147483647, %v332_v51  ;;  %v404_v63 = vand.u32 2147483647, %v340_v60 }
  0x33   : > { %473 = vst [vmem:[#allocation2 + $0x10] sm:$0xff] %v469_v56  ;;  %v449_v35 = vadd.f32 %v448_v29, %v387_v21  ;;  %v460_v39 = vadd.f32 %v459_v33, %v372_v25  ;;  %v336_v56 = vld [vmem:[%s625_s16 + $0x1d8] sm:$0xff] }
  0x34   : > { %474 = vst [vmem:[#allocation2] sm:$0xff] %v470_v27  ;;  %v400_v61 = vand.u32 2147483647, %v336_v56 }
  0x35   : > { %v450_v41 = vadd.f32 %v449_v35, %v391_v28  ;;  %v461_v44 = vadd.f32 %v460_v39, %v376_v32 }
  0x37   : > { %v451_v46 = vadd.f32 %v450_v41, %v395_v34  ;;  %v462_v49 = vadd.f32 %v461_v44, %v380_v38 }
  0x39   : > { %v452_v50 = vadd.f32 %v451_v46, %v399_v40  ;;  %v463_v54 = vadd.f32 %v462_v49, %v384_v43 }
  0x3a   :  { %v480_v5 = vld [vmem:[#allocation2 + $0x10] sm:$0xff] (%p267_p0) }
  0x3b   : > { %v453_v55 = vadd.f32 %v452_v50, %v403_v45  ;;  %v464_v58 = vadd.f32 %v463_v54, %v388_v48  ;;  %v481_v6 = vld [vmem:[#allocation2] sm:$0xff] (%p267_p0) }
  0x3c   :  { %v484_v8 = vadd.f32 (%p267_p0), %v481_v6, %v480_v5 }
  0x3d   : > { %v471_v59 = vadd.f32 %v453_v55, %v407_v52  ;;  %v465_v62 = vadd.f32 %v464_v58, %v392_v53 }
  0x3f   : > { %475 = vst [vmem:[#allocation2 + $0x18] sm:$0xff] %v471_v59  ;;  %v466_v0 = vadd.f32 %v465_v62, %v396_v57 }
  0x41   : > { %v467_v1 = vadd.f32 %v466_v0, %v400_v61 }
  0x43   : > { %v468_v3 = vadd.f32 %v467_v1, %v404_v63  ;;  %269 = sbr.rel (!%p267_p0) target bundleno = 11 (0xb), region = 73 }
  0x45   : > { %v472_v4 = vadd.f32 %v468_v3, %v408_v2 }
  0x46   :  { %v482_v7 = vld [vmem:[#allocation2 + $0x18] sm:$0xff] (%p267_p0) }
  0x47   : > { %476 = vst [vmem:[#allocation2 + $0x8] sm:$0xff] %v472_v4  ;;  %v485_v10 = vadd.f32 (%p267_p0), %v484_v8, %v482_v7 }
  0x4e   :  { %v483_v9 = vld [vmem:[#allocation2 + $0x8] sm:$0xff] }
  0x4f   :  { %v486_v11 = vadd.f32 %v485_v10, %v483_v9 }
  0x51   :  { %487 = vadd.xlane.f32.xlu0 %v486_v11 }
  0xc4   :  { %v488_v12 = vpop.xlane.xlu0 %487 }
  0xc5   :  { %v489_v13 = vrot.slane %v488_v12, 4 }
  0xc7   :  { %v490_v14 = vadd.f32 %v489_v13, %v488_v12 }
  0xc9   :  { %v491_v15 = vrot.slane %v490_v14, 2 }
  0xcb   :  { %v492_v16 = vadd.f32 %v491_v15, %v490_v14 }
  0xcd   :  { %v493_v17 = vrot.slane %v492_v16, 1 }
  0xcf   :  { %v494_v18 = vadd.f32 %v493_v17, %v492_v16 }
  0xd1   :  { %538 = vpush %v494_v18 }
 0x102   :  { %s539_s20 = spop %538 }
 0x103   :  { %497 = sst [smem:[#allocation6]] %s539_s20 }
 0x104   :  { %506 = dma.smem_to_hbm %s605_s21, 16, %s504_s19, [#allocation5]  }
 0x105   :  { %595 = dma.done.wait [#allocation5], 16  }
 0x106   :  { %596 = vsyncadd [#allocation5], 4294967280 }
 0x107   :  { %511 = sfence }
 0x108   :  { %512 = vsyncpa [#allocation4], 1 }
 0x109   :  { %513 = vsyncpa [#allocation5], 1 }

</bundles_post_ra>
